<compile_context>
chip_gen: v6e
topology: v6e:2x2x1
jax: 0.10.0
libtpu: 0.0.40
codegen_flags: <defaults>
</compile_context>

<pallas_src>
import functools

import jax
import jax.numpy as jnp
from jax.experimental import pallas as pl
from jax.experimental.pallas import tpu as pltpu

LANE = 128
VMEM_LIMIT_BYTES = 32 * 1024 * 1024  # conservative scoped-VMEM budget (v5e/v6e/v7x safe)


def _round_up(v, m):
    return (v + m - 1) // m * m


def _pad2d(a, rows, cols):
    return jnp.pad(a, ((0, rows - a.shape[0]), (0, cols - a.shape[1])))


# --------------------------------------------------------------- dense matmul
def _dense_kernel(x_ref, w_ref, o_ref):
    o_ref[...] = jnp.dot(x_ref[...], w_ref[...],
                         preferred_element_type=jnp.float32).astype(o_ref.dtype)


def _dense(x, w, tm):
    """y = x @ w, row-tiled; bf16 in/out, f32 MXU accumulation."""
    n, k = x.shape
    _, m = w.shape
    cost = pl.CostEstimate(flops=2 * n * k * m, transcendentals=0,
                           bytes_accessed=2 * (n * k + k * m + n * m))
    return pl.pallas_call(
        _dense_kernel,
        out_shape=jax.ShapeDtypeStruct((n, m), jnp.bfloat16),
        grid_spec=pltpu.PrefetchScalarGridSpec(
            num_scalar_prefetch=0,
            grid=(n // tm,),
            in_specs=[pl.BlockSpec((tm, k), lambda i: (i, 0)),
                      pl.BlockSpec((k, m), lambda i: (0, 0))],   # resident weight
            out_specs=pl.BlockSpec((tm, m), lambda i: (i, 0))),
        compiler_params=pltpu.CompilerParams(
            dimension_semantics=("parallel",),
            vmem_limit_bytes=VMEM_LIMIT_BYTES),
        cost_estimate=cost,
    )(x, w)


# ------------------------------------------- message passing: relu(A_hat @ hW)
def _spmm_relu_kernel(a_ref, hw_ref, o_ref, acc_ref, *, tk):
    k = pl.program_id(1)

    @pl.when(k == 0)
    def _():
        acc_ref[...] = jnp.zeros_like(acc_ref)

    start = pl.multiple_of(k * tk, tk)
    acc_ref[...] += jnp.dot(a_ref[...], hw_ref[pl.ds(start, tk), :],
                            preferred_element_type=jnp.float32)

    @pl.when(k == pl.num_programs(1) - 1)
    def _():
        o_ref[...] = jnp.maximum(acc_ref[...], 0.0).astype(o_ref.dtype)


def _spmm_relu(a_hat, hw, tile):
    # TODO(synk): A_hat is extremely sparse (ring graph, 3 nnz/row); a
    # scalar-prefetch driven block-sparse gather that skips all-zero tiles is
    # the next algorithmic win. Dense tiled SpMM kept here.
    n = a_hat.shape[0]
    d = hw.shape[1]
    cost = pl.CostEstimate(flops=2 * n * n * d, transcendentals=0,
                           bytes_accessed=2 * (n * n + 2 * n * d))
    kernel = functools.partial(_spmm_relu_kernel, tk=tile)
    return pl.pallas_call(
        kernel,
        out_shape=jax.ShapeDtypeStruct((n, d), jnp.bfloat16),
        grid_spec=pltpu.PrefetchScalarGridSpec(
            num_scalar_prefetch=0,
            grid=(n // tile, n // tile),
            in_specs=[pl.BlockSpec((tile, tile), lambda i, k: (i, k)),   # stream A_hat tiles
                      pl.BlockSpec((n, d), lambda i, k: (0, 0))],        # hW resident in VMEM
            out_specs=pl.BlockSpec((tile, d), lambda i, k: (i, 0)),
            scratch_shapes=[pltpu.VMEM((tile, d), jnp.float32)]),
        compiler_params=pltpu.CompilerParams(
            dimension_semantics=("parallel", "arbitrary"),
            vmem_limit_bytes=VMEM_LIMIT_BYTES),
        cost_estimate=cost,
    )(a_hat, hw)


# -------------------------- epilogue: centroid distance + mean pool + out linear
def _epilogue_kernel(h_ref, ct_ref, csq_ref, pool_ref, wo_ref, bo_ref, out_ref):
    h = h_ref[...]                                                        # [N, D] bf16
    cross = jnp.dot(h, ct_ref[...], preferred_element_type=jnp.float32)   # [N, C]
    h32 = h.astype(jnp.float32)
    h_sq = jnp.sum(h32 * h32, axis=-1, keepdims=True)                     # [N, 1]
    d2 = jnp.maximum(h_sq + csq_ref[...] - 2.0 * cross, 0.0)
    dist = jnp.sqrt(d2)                                                   # [N, C]
    pooled = jnp.dot(pool_ref[...], dist,
                     preferred_element_type=jnp.float32)                  # [G, C]
    out_ref[...] = (jnp.dot(pooled, wo_ref[...],
                            preferred_element_type=jnp.float32) + bo_ref[...])


def _epilogue(h, ct, c_sq, pool, wo, bo):
    n, d = h.shape
    c = ct.shape[1]
    g = pool.shape[0]
    cls = wo.shape[1]
    cost = pl.CostEstimate(
        flops=2 * n * d * c + 2 * g * n * c + 2 * g * c * cls + 4 * n * c,
        transcendentals=n * c,
        bytes_accessed=2 * (n * d + d * c) + 4 * (c + g * n + c * cls + cls + g * cls))
    vmem = pl.BlockSpec(memory_space=pltpu.MemorySpace.VMEM)
    return pl.pallas_call(
        _epilogue_kernel,
        out_shape=jax.ShapeDtypeStruct((g, cls), jnp.float32),
        in_specs=[vmem] * 6,
        out_specs=vmem,
        compiler_params=pltpu.CompilerParams(vmem_limit_bytes=VMEM_LIMIT_BYTES),
        cost_estimate=cost,
    )(h, ct, c_sq, pool, wo, bo)


# ---------------------------------------------------------------- full forward
def graph_classification_forward(x, a_hat, pool, w_embed, w_gcn,
                                 centroids, w_out, b_out):
    """Forward pass of GraphClassification (Euclidean manifold, eval mode)."""
    # TODO(synk): dropout inside ManifoldConv skipped (inference / p=0 semantics).
    n, f_in = x.shape
    num_layers, d, _ = w_gcn.shape
    num_centroid = centroids.shape[0]
    g = pool.shape[0]
    num_class = w_out.shape[1]

    # lane-dense padding
    n_pad = _round_up(n, LANE)
    f_pad = _round_up(f_in, LANE)
    d_pad = _round_up(d, LANE)
    c_pad = _round_up(num_centroid, LANE)
    cls_pad = _round_up(num_class, LANE)

    # A_hat tile size: biggest of {512, 256, 128} dividing n_pad (VMEM-safe on v7x)
    tile = 512 if n_pad % 512 == 0 else (256 if n_pad % 256 == 0 else 128)

    # wrapper-side padding / casts / constant precompute (plain JAX glue)
    x_p = _pad2d(x, n_pad, f_pad).astype(jnp.bfloat16)
    a_p = _pad2d(a_hat, n_pad, n_pad).astype(jnp.bfloat16)
    we_p = _pad2d(w_embed, f_pad, d_pad).astype(jnp.bfloat16)
    wg_p = jnp.stack([_pad2d(w_gcn[l], d_pad, d_pad)
                      for l in range(num_layers)]).astype(jnp.bfloat16)
    cent_p = _pad2d(centroids, c_pad, d_pad)                       # f32 [C_pad, D_pad]
    ct = jnp.transpose(cent_p).astype(jnp.bfloat16)                # [D_pad, C_pad]
    c_sq = jnp.sum(cent_p * cent_p, axis=-1)[None, :]              # [1, C_pad] f32
    pool_p = _pad2d(pool, g, n_pad)                                # [G, N_pad] f32
    wo_p = _pad2d(w_out, c_pad, cls_pad)                           # [C_pad, CLS_pad] f32
    bo_p = _pad2d(b_out, 1, cls_pad)                               # [1, CLS_pad] f32

    # embedding: h = x @ We
    h = _dense(x_p, we_p, tile)                                    # [N_pad, D_pad] bf16

    # ManifoldConv(GCNConv) x L: h = relu(A_hat @ (h @ Wl))
    for layer in range(num_layers):
        hw = _dense(h, wg_p[layer], tile)                          # [N_pad, D_pad] bf16
        h = _spmm_relu(a_p, hw, tile)                              # [N_pad, D_pad] bf16

    # CentroidDistance + mean pool + output_linear
    out_pad = _epilogue(h, ct, c_sq, pool_p, wo_p, bo_p)           # [G, CLS_pad] f32
    return out_pad[:, :num_class]


def reference_forward(x, a_hat, pool, w_embed, w_gcn, centroids, w_out, b_out):
    """Pure-JAX f32 reference for correctness checking."""
    h = x @ w_embed
    for layer in range(w_gcn.shape[0]):
        h = jnp.maximum(a_hat @ (h @ w_gcn[layer]), 0.0)
    d2 = (jnp.sum(h * h, -1, keepdims=True)
          + jnp.sum(centroids * centroids, -1)[None, :]
          - 2.0 * h @ centroids.T)
    dist = jnp.sqrt(jnp.maximum(d2, 0.0))
    return pool @ dist @ w_out + b_out


if __name__ == "__main__":
    # small shapes implied by the module's forward
    NODES_PER_GRAPH, NUM_GRAPHS = 32, 2
    N = NODES_PER_GRAPH * NUM_GRAPHS
    F_IN, EMBED_DIM, NUM_LAYERS = 16, 32, 2
    NUM_CENTROID, NUM_CLASS = 8, 4

    key = jax.random.PRNGKey(0)
    k = jax.random.split(key, 6)
    x = jax.random.normal(k[0], (N, F_IN), jnp.float32)
    # deterministic synthetic parameters (xavier-ish scaling)
    w_embed = jax.random.normal(k[1], (F_IN, EMBED_DIM), jnp.float32) / jnp.sqrt(F_IN)
    w_gcn = jax.random.normal(k[2], (NUM_LAYERS, EMBED_DIM, EMBED_DIM),
                              jnp.float32) / jnp.sqrt(EMBED_DIM)
    centroids = jax.random.normal(k[3], (NUM_CENTROID, EMBED_DIM), jnp.float32)
    w_out = jax.random.normal(k[4], (NUM_CENTROID, NUM_CLASS),
                              jnp.float32) / jnp.sqrt(NUM_CENTROID)
    b_out = jax.random.uniform(k[5], (1, NUM_CLASS), jnp.float32, -1e-4, 1e-4)

    # batch assignment: nodes [0,32) -> graph 0, [32,64) -> graph 1
    batch = jnp.concatenate([jnp.zeros(NODES_PER_GRAPH, jnp.int32),
                             jnp.ones(NODES_PER_GRAPH, jnp.int32)])

    # deterministic undirected ring inside each graph (vectorized construction)
    idx = jnp.arange(NODES_PER_GRAPH)
    ring = jnp.zeros((NODES_PER_GRAPH, NODES_PER_GRAPH), jnp.float32)
    ring = ring.at[idx, (idx + 1) % NODES_PER_GRAPH].set(1.0)
    ring = jnp.maximum(ring, ring.T)
    adj = jnp.kron(jnp.eye(NUM_GRAPHS, dtype=jnp.float32), ring)

    # GCN normalization: A_hat = D^{-1/2} (A + I) D^{-1/2}
    a_tilde = adj + jnp.eye(N, dtype=jnp.float32)
    d_inv_sqrt = 1.0 / jnp.sqrt(jnp.sum(a_tilde, axis=1))
    a_hat = a_tilde * d_inv_sqrt[:, None] * d_inv_sqrt[None, :]

    # per-graph mean pooling matrix P[g, n] = 1/|V_g| if batch[n] == g else 0
    onehot = (batch[None, :] == jnp.arange(NUM_GRAPHS)[:, None]).astype(jnp.float32)
    pool = onehot / jnp.sum(onehot, axis=1, keepdims=True)

    fwd = jax.jit(graph_classification_forward)
    out = fwd(x, a_hat, pool, w_embed, w_gcn, centroids, w_out, b_out)
    jax.block_until_ready(out)

    assert out.shape == (NUM_GRAPHS, NUM_CLASS) and out.dtype == jnp.float32
    ref = reference_forward(x, a_hat, pool, w_embed, w_gcn, centroids, w_out, b_out)
    assert bool(jnp.all(jnp.isfinite(out)))
    assert bool(jnp.allclose(out, ref, rtol=5e-2, atol=5e-1)), (out, ref)
    print("KERNEL_OK")
</pallas_src>

<mosaic_0001>
module attributes {stable_mosaic.version = 11 : i64} {
  func.func @_dense_kernel(%arg0: i32, %arg1: memref<128x128xbf16, #tpu.memory_space<vmem>>, %arg2: memref<128x128xbf16, #tpu.memory_space<vmem>>, %arg3: memref<128x128xbf16, #tpu.memory_space<vmem>>) attributes {dimension_semantics = [#tpu.dimension_semantics<parallel>], iteration_bounds = array<i64: 1>, scalar_prefetch = 0 : i64, scratch_operands = 0 : i64, tpu.core_type = #tpu.core_type<tc>, window_params = [{transform_indices = @transform_0, window_bounds = array<i64: 128, 128>}, {pipeline_mode = #tpu.pipeline_mode<synchronous>, transform_indices = @transform_1, window_bounds = array<i64: 128, 128>}, {transform_indices = @transform_2, window_bounds = array<i64: 128, 128>}]} {
    %c0 = arith.constant 0 : index
    %c0_0 = arith.constant 0 : index
    %0 = vector.load %arg1[%c0, %c0_0] : memref<128x128xbf16, #tpu.memory_space<vmem>>, vector<128x128xbf16>
    %c0_1 = arith.constant 0 : index
    %c0_2 = arith.constant 0 : index
    %1 = vector.load %arg2[%c0_1, %c0_2] : memref<128x128xbf16, #tpu.memory_space<vmem>>, vector<128x128xbf16>
    %cst = arith.constant dense<0.000000e+00> : vector<128x128xf32>
    %2 = tpu.matmul %0, %1, %cst {dimension_numbers = #tpu.dot_dimension_numbers<[1], [0], [0], [1], [0, 0, 1, 1], [], []>} : vector<128x128xbf16>, vector<128x128xbf16>, vector<128x128xf32> -> vector<128x128xf32>
    %3 = arith.truncf %2 : vector<128x128xf32> to vector<128x128xbf16>
    %c0_3 = arith.constant 0 : index
    %c0_4 = arith.constant 0 : index
    %4 = vector.load %arg3[%c0_3, %c0_4] : memref<128x128xbf16, #tpu.memory_space<vmem>>, vector<128x128xbf16>
    tpu.vector_store %arg3[%c0_3, %c0_4], %3 {strides = array<i32>} : memref<128x128xbf16, #tpu.memory_space<vmem>>, vector<128x128xbf16>,
    return
  }
  func.func @transform_0(%arg0: i32) -> (i32, i32) {
    %c0_i32 = arith.constant 0 : i32
    %c0_i32_0 = arith.constant 0 : i32
    return %arg0, %c0_i32 : i32, i32
  }
  func.func @transform_1(%arg0: i32) -> (i32, i32) {
    %c0_i32 = arith.constant 0 : i32
    %c0_i32_0 = arith.constant 0 : i32
    %c0_i32_1 = arith.constant 0 : i32
    return %c0_i32, %c0_i32_0 : i32, i32
  }
  func.func @transform_2(%arg0: i32) -> (i32, i32) {
    %c0_i32 = arith.constant 0 : i32
    %c0_i32_0 = arith.constant 0 : i32
    return %arg0, %c0_i32 : i32, i32
  }
}

module attributes {stable_mosaic.version = 11 : i64} {
  func.func @_spmm_relu_kernel(%arg0: i32, %arg1: i32, %arg2: memref<128x128xbf16, #tpu.memory_space<vmem>>, %arg3: memref<128x128xbf16, #tpu.memory_space<vmem>>, %arg4: memref<128x128xbf16, #tpu.memory_space<vmem>>, %arg5: memref<128x128xf32, #tpu.memory_space<vmem>>) attributes {dimension_semantics = [#tpu.dimension_semantics<parallel>, #tpu.dimension_semantics<arbitrary>], iteration_bounds = array<i64: 1, 1>, scalar_prefetch = 0 : i64, scratch_operands = 1 : i64, tpu.core_type = #tpu.core_type<tc>, window_params = [{transform_indices = @transform_0, window_bounds = array<i64: 128, 128>}, {pipeline_mode = #tpu.pipeline_mode<synchronous>, transform_indices = @transform_1, window_bounds = array<i64: 128, 128>}, {transform_indices = @transform_2, window_bounds = array<i64: 128, 128>}]} {
    %c0_i32 = arith.constant 0 : i32
    %0 = arith.cmpi eq, %arg1, %c0_i32 : i32
    %1 = arith.extui %0 : i1 to i32
    %c0_i32_0 = arith.constant 0 : i32
    %2 = arith.cmpi ne, %1, %c0_i32_0 : i32
    scf.if %2 {
      %cst_9 = arith.constant 0.000000e+00 : f32
      %15 = vector.broadcast %cst_9 : f32 to vector<128x128xf32>
      %c0_10 = arith.constant 0 : index
      %c0_11 = arith.constant 0 : index
      %16 = vector.load %arg5[%c0_10, %c0_11] : memref<128x128xf32, #tpu.memory_space<vmem>>, vector<128x128xf32>
      tpu.vector_store %arg5[%c0_10, %c0_11], %15 {strides = array<i32>} : memref<128x128xf32, #tpu.memory_space<vmem>>, vector<128x128xf32>,
    } else {
    }
    %c128_i32 = arith.constant 128 : i32
    %3 = arith.muli %arg1, %c128_i32 : i32
    %4 = tpu.assume_multiple %3, 128 : i32
    %c0 = arith.constant 0 : index
    %c0_1 = arith.constant 0 : index
    %5 = vector.load %arg5[%c0, %c0_1] : memref<128x128xf32, #tpu.memory_space<vmem>>, vector<128x128xf32>
    %c0_2 = arith.constant 0 : index
    %c0_3 = arith.constant 0 : index
    %6 = vector.load %arg2[%c0_2, %c0_3] : memref<128x128xbf16, #tpu.memory_space<vmem>>, vector<128x128xbf16>
    %7 = arith.index_cast %4 : i32 to index
    %c0_4 = arith.constant 0 : index
    %8 = vector.load %arg3[%7, %c0_4] : memref<128x128xbf16, #tpu.memory_space<vmem>>, vector<128x128xbf16>
    %cst = arith.constant dense<0.000000e+00> : vector<128x128xf32>
    %9 = tpu.matmul %6, %8, %cst {dimension_numbers = #tpu.dot_dimension_numbers<[1], [0], [0], [1], [0, 0, 1, 1], [], []>} : vector<128x128xbf16>, vector<128x128xbf16>, vector<128x128xf32> -> vector<128x128xf32>
    %10 = arith.addf %5, %9 : vector<128x128xf32>
    %c0_5 = arith.constant 0 : index
    %c0_6 = arith.constant 0 : index
    %11 = vector.load %arg5[%c0_5, %c0_6] : memref<128x128xf32, #tpu.memory_space<vmem>>, vector<128x128xf32>
    tpu.vector_store %arg5[%c0_5, %c0_6], %10 {strides = array<i32>} : memref<128x128xf32, #tpu.memory_space<vmem>>, vector<128x128xf32>,
    %c0_i32_7 = arith.constant 0 : i32
    %12 = arith.cmpi eq, %arg1, %c0_i32_7 : i32
    %13 = arith.extui %12 : i1 to i32
    %c0_i32_8 = arith.constant 0 : i32
    %14 = arith.cmpi ne, %13, %c0_i32_8 : i32
    scf.if %14 {
      %c0_9 = arith.constant 0 : index
      %c0_10 = arith.constant 0 : index
      %15 = vector.load %arg5[%c0_9, %c0_10] : memref<128x128xf32, #tpu.memory_space<vmem>>, vector<128x128xf32>
      %cst_11 = arith.constant 0.000000e+00 : f32
      %16 = vector.broadcast %cst_11 : f32 to vector<128x128xf32>
      %17 = arith.maximumf %15, %16 : vector<128x128xf32>
      %18 = arith.truncf %17 : vector<128x128xf32> to vector<128x128xbf16>
      %c0_12 = arith.constant 0 : index
      %c0_13 = arith.constant 0 : index
      %19 = vector.load %arg4[%c0_12, %c0_13] : memref<128x128xbf16, #tpu.memory_space<vmem>>, vector<128x128xbf16>
      tpu.vector_store %arg4[%c0_12, %c0_13], %18 {strides = array<i32>} : memref<128x128xbf16, #tpu.memory_space<vmem>>, vector<128x128xbf16>,
    } else {
    }
    return
  }
  func.func @transform_0(%arg0: i32, %arg1: i32) -> (i32, i32) {
    %c0_i32 = arith.constant 0 : i32
    return %arg0, %arg1 : i32, i32
  }
  func.func @transform_1(%arg0: i32, %arg1: i32) -> (i32, i32) {
    %c0_i32 = arith.constant 0 : i32
    %c0_i32_0 = arith.constant 0 : i32
    %c0_i32_1 = arith.constant 0 : i32
    return %c0_i32, %c0_i32_0 : i32, i32
  }
  func.func @transform_2(%arg0: i32, %arg1: i32) -> (i32, i32) {
    %c0_i32 = arith.constant 0 : i32
    %c0_i32_0 = arith.constant 0 : i32
    return %arg0, %c0_i32 : i32, i32
  }
}

module attributes {stable_mosaic.version = 11 : i64} {
  func.func @_epilogue_kernel(%arg0: memref<128x128xbf16, #tpu.memory_space<vmem>>, %arg1: memref<128x128xbf16, #tpu.memory_space<vmem>>, %arg2: memref<1x128xf32, #tpu.memory_space<vmem>>, %arg3: memref<2x128xf32, #tpu.memory_space<vmem>>, %arg4: memref<128x128xf32, #tpu.memory_space<vmem>>, %arg5: memref<1x128xf32, #tpu.memory_space<vmem>>, %arg6: memref<2x128xf32, #tpu.memory_space<vmem>>) attributes {dimension_semantics = [], scalar_prefetch = 0 : i64, scratch_operands = 0 : i64, tpu.core_type = #tpu.core_type<tc>} {
    %c0 = arith.constant 0 : index
    %c0_0 = arith.constant 0 : index
    %0 = vector.load %arg0[%c0, %c0_0] : memref<128x128xbf16, #tpu.memory_space<vmem>>, vector<128x128xbf16>
    %c0_1 = arith.constant 0 : index
    %c0_2 = arith.constant 0 : index
    %1 = vector.load %arg1[%c0_1, %c0_2] : memref<128x128xbf16, #tpu.memory_space<vmem>>, vector<128x128xbf16>
    %cst = arith.constant dense<0.000000e+00> : vector<128x128xf32>
    %2 = tpu.matmul %0, %1, %cst {dimension_numbers = #tpu.dot_dimension_numbers<[1], [0], [0], [1], [0, 0, 1, 1], [], []>} : vector<128x128xbf16>, vector<128x128xbf16>, vector<128x128xf32> -> vector<128x128xf32>
    %3 = arith.extf %0 : vector<128x128xbf16> to vector<128x128xf32>
    %4 = arith.mulf %3, %3 : vector<128x128xf32>
    %cst_3 = arith.constant dense<0.000000e+00> : vector<128xf32>
    %5 = vector.multi_reduction <add>, %4, %cst_3 [1] : vector<128x128xf32> to vector<128xf32>
    %6 = vector.shape_cast %5 : vector<128xf32> to vector<128x1xf32>
    %c0_4 = arith.constant 0 : index
    %c0_5 = arith.constant 0 : index
    %7 = vector.load %arg2[%c0_4, %c0_5] : memref<1x128xf32, #tpu.memory_space<vmem>>, vector<1x128xf32>
    %8 = vector.broadcast %6 : vector<128x1xf32> to vector<128x128xf32>
    %9 = vector.broadcast %7 : vector<1x128xf32> to vector<128x128xf32>
    %10 = arith.addf %8, %9 : vector<128x128xf32>
    %cst_6 = arith.constant 2.000000e+00 : f32
    %11 = vector.broadcast %cst_6 : f32 to vector<128x128xf32>
    %12 = arith.mulf %11, %2 : vector<128x128xf32>
    %13 = arith.subf %10, %12 : vector<128x128xf32>
    %cst_7 = arith.constant 0.000000e+00 : f32
    %14 = vector.broadcast %cst_7 : f32 to vector<128x128xf32>
    %15 = arith.maximumf %13, %14 : vector<128x128xf32>
    %16 = math.sqrt %15 : vector<128x128xf32>
    %c0_8 = arith.constant 0 : index
    %c0_9 = arith.constant 0 : index
    %17 = vector.load %arg3[%c0_8, %c0_9] : memref<2x128xf32, #tpu.memory_space<vmem>>, vector<2x128xf32>
    %cst_10 = arith.constant dense<0.000000e+00> : vector<2x128xf32>
    %18 = tpu.matmul %17, %16, %cst_10 {dimension_numbers = #tpu.dot_dimension_numbers<[1], [0], [0], [1], [0, 0, 1, 1], [], []>} : vector<2x128xf32>, vector<128x128xf32>, vector<2x128xf32> -> vector<2x128xf32>
    %c0_11 = arith.constant 0 : index
    %c0_12 = arith.constant 0 : index
    %19 = vector.load %arg4[%c0_11, %c0_12] : memref<128x128xf32, #tpu.memory_space<vmem>>, vector<128x128xf32>
    %cst_13 = arith.constant dense<0.000000e+00> : vector<2x128xf32>
    %20 = tpu.matmul %18, %19, %cst_13 {dimension_numbers = #tpu.dot_dimension_numbers<[1], [0], [0], [1], [0, 0, 1, 1], [], []>} : vector<2x128xf32>, vector<128x128xf32>, vector<2x128xf32> -> vector<2x128xf32>
    %c0_14 = arith.constant 0 : index
    %c0_15 = arith.constant 0 : index
    %21 = vector.load %arg5[%c0_14, %c0_15] : memref<1x128xf32, #tpu.memory_space<vmem>>, vector<1x128xf32>
    %22 = vector.broadcast %21 : vector<1x128xf32> to vector<2x128xf32>
    %23 = arith.addf %20, %22 : vector<2x128xf32>
    %c0_16 = arith.constant 0 : index
    %c0_17 = arith.constant 0 : index
    %24 = vector.load %arg6[%c0_16, %c0_17] : memref<2x128xf32, #tpu.memory_space<vmem>>, vector<2x128xf32>
    tpu.vector_store %arg6[%c0_16, %c0_17], %23 {strides = array<i32>} : memref<2x128xf32, #tpu.memory_space<vmem>>, vector<2x128xf32>,
    return
  }
}

</mosaic_0001>

<bundles_post_ra>
// kernel: graph_classification_forward.6
= control target key start
LH: loop header
LB: loop body
LE: loop exit
PB: predicated region body
PF: predicated region fallthrough
CT: control target
= control target key end

     0   :  { %s583_s1 = inlined_call_operand.vmem [shape: bf16[128,128], index: 1, kind: input, shape index: {}]   ;;  %s584_s0 = inlined_call_operand.vmem [shape: bf16[128,128], index: 0, kind: input, shape index: {}]   ;;  %s585_s2 = inlined_call_operand.vmem [shape: bf16[128,128], index: 2, kind: output, shape index: {}]  }
   0x1   :  { %v480_v0 = vld [vmem:[%s583_s1 + $0x38] sm:$0xff]   ;;  %v481_v1 = vld [vmem:[%s583_s1 + $0x30] sm:$0xff]   ;;  %v482_v2 = vld [vmem:[%s583_s1 + $0x28] sm:$0xff]  }
   0x2   :  { %432 = vmatprep.subr.bf16.mxu0 %v480_v0  ;;  %464 = vmatprep.subr.bf16.mxu1 %v480_v0  ;;  %v483_v3 = vld [vmem:[%s583_s1 + $0x20] sm:$0xff]   ;;  %v484_v6 = vld [vmem:[%s583_s1 + $0x18] sm:$0xff]   ;;  %v485_v7 = vld [vmem:[%s583_s1 + $0x10] sm:$0xff]  }
   0x3   :  { %433 = vmatpush3.bf16.msra.mxu0 %v480_v0  ;;  %472 = vmatpush3.bf16.msra.mxu1 %v480_v0  ;;  %v488_v4 = vld [vmem:[%s584_s0] sm:$0xff]   ;;  %v486_v8 = vld [vmem:[%s583_s1 + $0x8] sm:$0xff]   ;;  %v492_v12 = vld [vmem:[%s584_s0 + $0x10] sm:$0xff]  }
   0x4   :  { %434 = vmatprep.subr.bf16.mxu0 %v481_v1  ;;  %465 = vmatprep.subr.bf16.mxu1 %v481_v1  ;;  %v489_v5 = vld [vmem:[%s584_s0 + $0x20] sm:$0xff]   ;;  %v490_v10 = vld [vmem:[%s584_s0 + $0x8] sm:$0xff]   ;;  %v493_v13 = vld [vmem:[%s584_s0 + $0x30] sm:$0xff]  }
   0x5   :  { %448 = vmatprep.mubr.bf16.mxu0 %v488_v4  ;;  %456 = vmatprep.mubr.bf16.mxu1 %v489_v5  ;;  %v487_v9 = vld [vmem:[%s583_s1] sm:$0xff]   ;;  %v491_v11 = vld [vmem:[%s584_s0 + $0x28] sm:$0xff]   ;;  %v494_v14 = vld [vmem:[%s584_s0 + $0x18] sm:$0xff]  }
   0x6   :  { %v495_v15 = vld [vmem:[%s584_s0 + $0x38] sm:$0xff]  }
   0x7   :  { %435 = vmatpush3.bf16.msra.mxu0 %v481_v1  ;;  %473 = vmatpush3.bf16.msra.mxu1 %v481_v1 }
   0x8   :  { %436 = vmatprep.subr.bf16.mxu0 %v482_v2  ;;  %466 = vmatprep.subr.bf16.mxu1 %v482_v2 }
   0xb   :  { %437 = vmatpush3.bf16.msra.mxu0 %v482_v2  ;;  %474 = vmatpush3.bf16.msra.mxu1 %v482_v2 }
   0xc   :  { %438 = vmatprep.subr.bf16.mxu0 %v483_v3  ;;  %467 = vmatprep.subr.bf16.mxu1 %v483_v3 }
   0xf   :  { %439 = vmatpush3.bf16.msra.mxu0 %v483_v3  ;;  %475 = vmatpush3.bf16.msra.mxu1 %v483_v3 }
  0x10   :  { %440 = vmatprep.subr.bf16.mxu0 %v484_v6  ;;  %468 = vmatprep.subr.bf16.mxu1 %v484_v6 }
  0x13   :  { %441 = vmatpush3.bf16.msra.mxu0 %v484_v6  ;;  %476 = vmatpush3.bf16.msra.mxu1 %v484_v6 }
  0x14   :  { %442 = vmatprep.subr.bf16.mxu0 %v485_v7  ;;  %469 = vmatprep.subr.bf16.mxu1 %v485_v7 }
  0x17   :  { %443 = vmatpush3.bf16.msra.mxu0 %v485_v7  ;;  %477 = vmatpush3.bf16.msra.mxu1 %v485_v7 }
  0x18   :  { %444 = vmatprep.subr.bf16.mxu0 %v486_v8  ;;  %470 = vmatprep.subr.bf16.mxu1 %v486_v8 }
  0x1b   :  { %445 = vmatpush3.bf16.msra.mxu0 %v486_v8  ;;  %478 = vmatpush3.bf16.msra.mxu1 %v486_v8 }
  0x1c   :  { %446 = vmatprep.subr.bf16.mxu0 %v487_v9  ;;  %471 = vmatprep.subr.bf16.mxu1 %v487_v9 }
  0x1f   :  { %447 = vmatpush3.bf16.msra.mxu0 %v487_v9  ;;  %479 = vmatpush3.bf16.msra.mxu1 %v487_v9 }
  0x22   :  { %449 = vmatmul.mubr.bf16.vlgmr.msra.gmra.mxu0 %v490_v10  ;;  %457 = vmatmul.mubr.bf16.vlgmr.msra.gmra.mxu1 %v491_v11 }
  0x23   :  { %452 = vmatprep.mubr.bf16.mxu0 %v492_v12  ;;  %460 = vmatprep.mubr.bf16.mxu1 %v493_v13 }
  0x2a   :  { %453 = vmatmul.mubr.bf16.gmra.mxu0 %v494_v14  ;;  %461 = vmatmul.mubr.bf16.gmra.mxu1 %v495_v15 }
  0xe2   :  { %v450_v16 = vpop.f32.mrf.mxu0  ;;  %v458_v17 = vpop.f32.mrf.mxu1 }
  0xe4   :  { %v174_v18 = vpop.f32.mrf.mxu0  ;;  %v206_v19 = vpop.f32.mrf.mxu1 }
  0xe6   :  { %v451_v20 = vpop.f32.mrf.mxu0  ;;  %v459_v21 = vpop.f32.mrf.mxu1 }
  0xe7   :  { %v377_v22 = vpack.c.bf16 %v451_v20, %v450_v16  ;;  %v397_v23 = vpack.c.bf16 %v459_v21, %v458_v17 }
  0xe8   :  { %v177_v24 = vpop.f32.mrf.mxu0  ;;  %v209_v25 = vpop.f32.mrf.mxu1 }
  0xe9   :  { %409 = vst [vmem:[%s585_s2 + $0x8] sm:$0xff] %v377_v22   ;;  %413 = vst [vmem:[%s585_s2 + $0x28] sm:$0xff] %v397_v23   ;;  %v372_v26 = vpack.c.bf16 %v177_v24, %v174_v18  ;;  %v392_v27 = vpack.c.bf16 %v209_v25, %v206_v19 }
  0xea   :  { %v454_v28 = vpop.f32.mrf.mxu0  ;;  %v462_v29 = vpop.f32.mrf.mxu1 }
  0xeb   :  { %373 = vst [vmem:[%s585_s2] sm:$0xff] %v372_v26   ;;  %412 = vst [vmem:[%s585_s2 + $0x20] sm:$0xff] %v392_v27  }
  0xec   :  { %v190_v30 = vpop.f32.mrf.mxu0  ;;  %v222_v31 = vpop.f32.mrf.mxu1 }
  0xee   :  { %v455_v32 = vpop.f32.mrf.mxu0  ;;  %v463_v33 = vpop.f32.mrf.mxu1 }
  0xef   :  { %v387_v34 = vpack.c.bf16 %v455_v32, %v454_v28  ;;  %v407_v35 = vpack.c.bf16 %v463_v33, %v462_v29 }
  0xf0   :  { %v193_v36 = vpop.f32.mrf.mxu0  ;;  %v225_v37 = vpop.f32.mrf.mxu1 }
  0xf1   :  { %411 = vst [vmem:[%s585_s2 + $0x18] sm:$0xff] %v387_v34   ;;  %415 = vst [vmem:[%s585_s2 + $0x38] sm:$0xff] %v407_v35   ;;  %v382_v38 = vpack.c.bf16 %v193_v36, %v190_v30  ;;  %v402_v39 = vpack.c.bf16 %v225_v37, %v222_v31 }
  0xf3   :  { %410 = vst [vmem:[%s585_s2 + $0x10] sm:$0xff] %v382_v38   ;;  %414 = vst [vmem:[%s585_s2 + $0x30] sm:$0xff] %v402_v39  }

// kernel: graph_classification_forward.8
= control target key start
LH: loop header
LB: loop body
LE: loop exit
PB: predicated region body
PF: predicated region fallthrough
CT: control target
= control target key end

     0   :  { %s693_s1 = inlined_call_operand.vmem [shape: bf16[128,128], index: 1, kind: input, shape index: {}]   ;;  %s694_s0 = inlined_call_operand.vmem [shape: bf16[128,128], index: 0, kind: input, shape index: {}]   ;;  %s695_s2 = inlined_call_operand.vmem [shape: bf16[128,128], index: 2, kind: output, shape index: {}]  }
   0x1   :  { %v590_v0 = vld [vmem:[%s693_s1 + $0x38] sm:$0xff]   ;;  %v591_v1 = vld [vmem:[%s693_s1 + $0x30] sm:$0xff]   ;;  %v592_v2 = vld [vmem:[%s693_s1 + $0x28] sm:$0xff]  }
   0x2   :  { %542 = vmatprep.subr.bf16.mxu0 %v590_v0  ;;  %574 = vmatprep.subr.bf16.mxu1 %v590_v0  ;;  %v593_v3 = vld [vmem:[%s693_s1 + $0x20] sm:$0xff]   ;;  %v594_v6 = vld [vmem:[%s693_s1 + $0x18] sm:$0xff]   ;;  %v595_v7 = vld [vmem:[%s693_s1 + $0x10] sm:$0xff]  }
   0x3   :  { %543 = vmatpush3.bf16.msra.mxu0 %v590_v0  ;;  %582 = vmatpush3.bf16.msra.mxu1 %v590_v0  ;;  %v598_v4 = vld [vmem:[%s694_s0] sm:$0xff]   ;;  %v596_v8 = vld [vmem:[%s693_s1 + $0x8] sm:$0xff]   ;;  %v602_v12 = vld [vmem:[%s694_s0 + $0x10] sm:$0xff]  }
   0x4   :  { %544 = vmatprep.subr.bf16.mxu0 %v591_v1  ;;  %575 = vmatprep.subr.bf16.mxu1 %v591_v1  ;;  %v599_v5 = vld [vmem:[%s694_s0 + $0x20] sm:$0xff]   ;;  %v600_v10 = vld [vmem:[%s694_s0 + $0x8] sm:$0xff]   ;;  %v603_v13 = vld [vmem:[%s694_s0 + $0x30] sm:$0xff]  }
   0x5   :  { %558 = vmatprep.mubr.bf16.mxu0 %v598_v4  ;;  %566 = vmatprep.mubr.bf16.mxu1 %v599_v5  ;;  %v597_v9 = vld [vmem:[%s693_s1] sm:$0xff]   ;;  %v601_v11 = vld [vmem:[%s694_s0 + $0x28] sm:$0xff]   ;;  %v604_v14 = vld [vmem:[%s694_s0 + $0x18] sm:$0xff]  }
   0x6   :  { %v605_v15 = vld [vmem:[%s694_s0 + $0x38] sm:$0xff]  }
   0x7   :  { %545 = vmatpush3.bf16.msra.mxu0 %v591_v1  ;;  %583 = vmatpush3.bf16.msra.mxu1 %v591_v1 }
   0x8   :  { %546 = vmatprep.subr.bf16.mxu0 %v592_v2  ;;  %576 = vmatprep.subr.bf16.mxu1 %v592_v2 }
   0xb   :  { %547 = vmatpush3.bf16.msra.mxu0 %v592_v2  ;;  %584 = vmatpush3.bf16.msra.mxu1 %v592_v2 }
   0xc   :  { %548 = vmatprep.subr.bf16.mxu0 %v593_v3  ;;  %577 = vmatprep.subr.bf16.mxu1 %v593_v3 }
   0xf   :  { %549 = vmatpush3.bf16.msra.mxu0 %v593_v3  ;;  %585 = vmatpush3.bf16.msra.mxu1 %v593_v3 }
  0x10   :  { %550 = vmatprep.subr.bf16.mxu0 %v594_v6  ;;  %578 = vmatprep.subr.bf16.mxu1 %v594_v6 }
  0x13   :  { %551 = vmatpush3.bf16.msra.mxu0 %v594_v6  ;;  %586 = vmatpush3.bf16.msra.mxu1 %v594_v6 }
  0x14   :  { %552 = vmatprep.subr.bf16.mxu0 %v595_v7  ;;  %579 = vmatprep.subr.bf16.mxu1 %v595_v7 }
  0x17   :  { %553 = vmatpush3.bf16.msra.mxu0 %v595_v7  ;;  %587 = vmatpush3.bf16.msra.mxu1 %v595_v7 }
  0x18   :  { %554 = vmatprep.subr.bf16.mxu0 %v596_v8  ;;  %580 = vmatprep.subr.bf16.mxu1 %v596_v8 }
  0x1b   :  { %555 = vmatpush3.bf16.msra.mxu0 %v596_v8  ;;  %588 = vmatpush3.bf16.msra.mxu1 %v596_v8 }
  0x1c   :  { %556 = vmatprep.subr.bf16.mxu0 %v597_v9  ;;  %581 = vmatprep.subr.bf16.mxu1 %v597_v9 }
  0x1f   :  { %557 = vmatpush3.bf16.msra.mxu0 %v597_v9  ;;  %589 = vmatpush3.bf16.msra.mxu1 %v597_v9 }
  0x22   :  { %559 = vmatmul.mubr.bf16.vlgmr.msra.gmra.mxu0 %v600_v10  ;;  %567 = vmatmul.mubr.bf16.vlgmr.msra.gmra.mxu1 %v601_v11 }
  0x23   :  { %562 = vmatprep.mubr.bf16.mxu0 %v602_v12  ;;  %570 = vmatprep.mubr.bf16.mxu1 %v603_v13 }
  0x2a   :  { %563 = vmatmul.mubr.bf16.gmra.mxu0 %v604_v14  ;;  %571 = vmatmul.mubr.bf16.gmra.mxu1 %v605_v15 }
  0xe2   :  { %v560_v16 = vpop.f32.mrf.mxu0  ;;  %v568_v17 = vpop.f32.mrf.mxu1 }
  0xe3   :  { %v331_v22 = vmax.f32 %v560_v16, 0.0  ;;  %v339_v23 = vmax.f32 %v568_v17, 0.0 }
  0xe4   :  { %v215_v18 = vpop.f32.mrf.mxu0  ;;  %v247_v19 = vpop.f32.mrf.mxu1 }
  0xe5   :  { %v329_v26 = vmax.f32 %v215_v18, 0.0  ;;  %v337_v27 = vmax.f32 %v247_v19, 0.0 }
  0xe6   :  { %v561_v20 = vpop.f32.mrf.mxu0  ;;  %v569_v21 = vpop.f32.mrf.mxu1 }
  0xe7   :  { %v332_v24 = vmax.f32 %v561_v20, 0.0  ;;  %v340_v25 = vmax.f32 %v569_v21, 0.0 }
  0xe8   :  { %v218_v28 = vpop.f32.mrf.mxu0  ;;  %v250_v29 = vpop.f32.mrf.mxu1 }
  0xe9   :  { %v487_v30 = vpack.c.bf16 %v332_v24, %v331_v22  ;;  %v507_v31 = vpack.c.bf16 %v340_v25, %v339_v23  ;;  %v330_v32 = vmax.f32 %v218_v28, 0.0  ;;  %v338_v33 = vmax.f32 %v250_v29, 0.0 }
  0xea   :  { %v564_v34 = vpop.f32.mrf.mxu0  ;;  %v572_v35 = vpop.f32.mrf.mxu1 }
  0xeb   :  { %519 = vst [vmem:[%s695_s2 + $0x8] sm:$0xff] %v487_v30   ;;  %523 = vst [vmem:[%s695_s2 + $0x28] sm:$0xff] %v507_v31   ;;  %v482_v36 = vpack.c.bf16 %v330_v32, %v329_v26  ;;  %v502_v37 = vpack.c.bf16 %v338_v33, %v337_v27  ;;  %v335_v42 = vmax.f32 %v564_v34, 0.0  ;;  %v343_v43 = vmax.f32 %v572_v35, 0.0 }
  0xec   :  { %v231_v38 = vpop.f32.mrf.mxu0  ;;  %v263_v39 = vpop.f32.mrf.mxu1 }
  0xed   :  { %483 = vst [vmem:[%s695_s2] sm:$0xff] %v482_v36   ;;  %522 = vst [vmem:[%s695_s2 + $0x20] sm:$0xff] %v502_v37   ;;  %v333_v46 = vmax.f32 %v231_v38, 0.0  ;;  %v341_v47 = vmax.f32 %v263_v39, 0.0 }
  0xee   :  { %v565_v40 = vpop.f32.mrf.mxu0  ;;  %v573_v41 = vpop.f32.mrf.mxu1 }
  0xef   :  { %v336_v44 = vmax.f32 %v565_v40, 0.0  ;;  %v344_v45 = vmax.f32 %v573_v41, 0.0 }
  0xf0   :  { %v234_v48 = vpop.f32.mrf.mxu0  ;;  %v266_v49 = vpop.f32.mrf.mxu1 }
  0xf1   :  { %v497_v50 = vpack.c.bf16 %v336_v44, %v335_v42  ;;  %v517_v51 = vpack.c.bf16 %v344_v45, %v343_v43  ;;  %v334_v52 = vmax.f32 %v234_v48, 0.0  ;;  %v342_v53 = vmax.f32 %v266_v49, 0.0 }
  0xf3   :  { %521 = vst [vmem:[%s695_s2 + $0x18] sm:$0xff] %v497_v50   ;;  %525 = vst [vmem:[%s695_s2 + $0x38] sm:$0xff] %v517_v51   ;;  %v492_v54 = vpack.c.bf16 %v334_v52, %v333_v46  ;;  %v512_v55 = vpack.c.bf16 %v342_v53, %v341_v47 }
  0xf5   :  { %520 = vst [vmem:[%s695_s2 + $0x10] sm:$0xff] %v492_v54   ;;  %524 = vst [vmem:[%s695_s2 + $0x30] sm:$0xff] %v512_v55  }

// kernel: graph_classification_forward.11
= control target key start
LH: loop header
LB: loop body
LE: loop exit
PB: predicated region body
PF: predicated region fallthrough
CT: control target
= control target key end

     0   :  { %s1280_s0 = inlined_call_operand.vmem [shape: bf16[128,128], index: 0, kind: input, shape index: {}]   ;;  %s1281_s1 = inlined_call_operand.vmem [shape: bf16[128,128], index: 1, kind: input, shape index: {}]   ;;  %s1282_s2 = inlined_call_operand.vmem [shape: f32[1,128], index: 2, kind: input, shape index: {}]   ;;  %s1283_s3 = inlined_call_operand.vmem [shape: f32[2,128], index: 3, kind: input, shape index: {}]   ;;  %s1284_s4 = inlined_call_operand.vmem [shape: f32[128,128], index: 4, kind: input, shape index: {}]   ;;  %s1285_s5 = inlined_call_operand.vmem [shape: f32[1,128], index: 5, kind: input, shape index: {}]   ;;  %s1286_s6 = inlined_call_operand.hbm [shape: f32[2,128], index: 6, kind: output, shape index: {}]  }
   0x1   :  { %v849_v0 = vld [vmem:[%s1281_s1 + $0x38] sm:$0xff]   ;;  %v850_v1 = vld [vmem:[%s1281_s1 + $0x30] sm:$0xff]   ;;  %v851_v2 = vld [vmem:[%s1281_s1 + $0x28] sm:$0xff]  }
   0x2   :  { %744 = vmatprep.subr.bf16.mxu0 %v849_v0  ;;  %v852_v3 = vld [vmem:[%s1281_s1 + $0x20] sm:$0xff]   ;;  %v985_v5 = vld [vmem:[%s1280_s0 + $0x30] sm:$0xff]   ;;  %v990_v6 = vld [vmem:[%s1280_s0 + $0x38] sm:$0xff]  }
   0x3   :  { %745 = vmatpush3.bf16.msra.mxu0 %v849_v0  ;;  %v980_v4 = vld [vmem:[%s1280_s0] sm:$0xff]   ;;  %v263_v7 = vunpack.c.h.bf16 %v985_v5  ;;  %v265_v8 = vunpack.c.h.bf16 %v990_v6 }
   0x4   :  { %746 = vmatprep.subr.bf16.mxu0 %v850_v1  ;;  %760 = vmatprep.mubr.bf16.mxu0 %v980_v4 }
   0x7   :  { %747 = vmatpush3.bf16.msra.mxu0 %v850_v1 }
   0x8   :  { %748 = vmatprep.subr.bf16.mxu0 %v851_v2 }
   0xb   :  { %749 = vmatpush3.bf16.msra.mxu0 %v851_v2 }
   0xc   :  { %11 = vsyncpa [#allocation3], 0  ;;  %750 = vmatprep.subr.bf16.mxu0 %v852_v3  ;;  %v853_v9 = vld [vmem:[%s1281_s1 + $0x18] sm:$0xff]   ;;  %v262_v10 = vunpack.c.l.bf16 %v985_v5  ;;  %v264_v11 = vunpack.c.l.bf16 %v990_v6  ;;  %v279_v12 = vmul.f32 %v263_v7, %v263_v7  ;;  %v281_v13 = vmul.f32 %v265_v8, %v265_v8  ;;  %v35_v14 = vld [vmem:[%s1280_s0 + $0x28] sm:$0xff]   ;;  %s929_s13 = smov [#allocation2]  }
   0xd   :  { %v260_v16 = vunpack.c.l.bf16 %v35_v14  ;;  %v854_v17 = vld [vmem:[%s1281_s1 + $0x10] sm:$0xff]   ;;  %v261_v19 = vunpack.c.h.bf16 %v35_v14  ;;  %v33_v20 = vld [vmem:[%s1280_s0 + $0x20] sm:$0xff]   ;;  %v855_v23 = vld [vmem:[%s1281_s1 + $0x8] sm:$0xff]   ;;  %v250_v43 = vunpack.c.l.bf16 %v980_v4  ;;  %v251_v45 = vunpack.c.h.bf16 %v980_v4  ;;  %s668_s14 = sshll.u32 %s929_s13, 4  ;;  %s669_s14 = int_to_ptr.vmem [resolvable:$true] %s668_s14 }
   0xe   :  { %308 = vadd.xlane.f32.xlu1 %v279_v12  ;;  %v278_v15 = vmul.f32 %v262_v10, %v262_v10  ;;  %312 = vadd.xlane.f32.xlu0 %v281_v13  ;;  %v280_v18 = vmul.f32 %v264_v11, %v264_v11  ;;  %v258_v22 = vunpack.c.l.bf16 %v33_v20  ;;  %v259_v25 = vunpack.c.h.bf16 %v33_v20  ;;  %v31_v26 = vld [vmem:[%s1280_s0 + $0x18] sm:$0xff]   ;;  %v856_v29 = vld [vmem:[%s1281_s1] sm:$0xff]   ;;  %v29_v32 = vld [vmem:[%s1280_s0 + $0x10] sm:$0xff]   ;;  %p910_p1 = scmp.lt.s32.totalorder %s669_s14, %s669_s14 }
   0xf   :  { %751 = vmatpush3.bf16.msra.mxu0 %v852_v3  ;;  %v276_v21 = vmul.f32 %v260_v16, %v260_v16  ;;  %v277_v24 = vmul.f32 %v261_v19, %v261_v19  ;;  %v256_v28 = vunpack.c.l.bf16 %v31_v26  ;;  %v257_v31 = vunpack.c.h.bf16 %v31_v26  ;;  %v27_v33 = vld [vmem:[%s1280_s0 + $0x8] sm:$0xff]   ;;  %v583_v49 = vld [vmem:[%s1284_s4 + $0x78] sm:$0xff]  ;;  %v582_v50 = vld [vmem:[%s1284_s4 + $0x70] sm:$0xff] }
  0x10   :  { %752 = vmatprep.subr.bf16.mxu0 %v853_v9  ;;  %v274_v27 = vmul.f32 %v258_v22, %v258_v22  ;;  %v275_v30 = vmul.f32 %v259_v25, %v259_v25  ;;  %v254_v35 = vunpack.c.l.bf16 %v29_v32  ;;  %v255_v37 = vunpack.c.h.bf16 %v29_v32  ;;  %v581_v51 = vld [vmem:[%s1284_s4 + $0x68] sm:$0xff]  ;;  %v580_v52 = vld [vmem:[%s1284_s4 + $0x60] sm:$0xff]  ;;  %v579_v53 = vld [vmem:[%s1284_s4 + $0x58] sm:$0xff] }
  0x11   :  { %v272_v34 = vmul.f32 %v256_v28, %v256_v28  ;;  %v273_v36 = vmul.f32 %v257_v31, %v257_v31  ;;  %v252_v39 = vunpack.c.l.bf16 %v27_v33  ;;  %v253_v41 = vunpack.c.h.bf16 %v27_v33  ;;  %v578_v54 = vld [vmem:[%s1284_s4 + $0x50] sm:$0xff]  ;;  %v577_v55 = vld [vmem:[%s1284_s4 + $0x48] sm:$0xff]  ;;  %v576_v56 = vld [vmem:[%s1284_s4 + $0x40] sm:$0xff] }
  0x12   :  { %306 = vadd.xlane.f32.xlu1 %v278_v15  ;;  %310 = vadd.xlane.f32.xlu0 %v280_v18  ;;  %v270_v38 = vmul.f32 %v254_v35, %v254_v35  ;;  %v271_v40 = vmul.f32 %v255_v37, %v255_v37  ;;  %v266_v46 = vmul.f32 %v250_v43, %v250_v43  ;;  %v927_v48 = vmov 0.0   ;;  %v575_v57 = vld [vmem:[%s1284_s4 + $0x38] sm:$0xff]  ;;  %v574_v58 = vld [vmem:[%s1284_s4 + $0x30] sm:$0xff]  ;;  %v573_v59 = vld [vmem:[%s1284_s4 + $0x28] sm:$0xff] }
  0x13   :  { %753 = vmatpush3.bf16.msra.mxu0 %v853_v9  ;;  %v268_v42 = vmul.f32 %v252_v39, %v252_v39  ;;  %v269_v44 = vmul.f32 %v253_v41, %v253_v41  ;;  %v267_v47 = vmul.f32 %v251_v45, %v251_v45  ;;  %776 = vmatprep.subr.mxu1 %v927_v48  ;;  %vm928_vm0 = vmmov 0   ;;  %v572_v60 = vld [vmem:[%s1284_s4 + $0x20] sm:$0xff]  ;;  %v571_v61 = vld [vmem:[%s1284_s4 + $0x18] sm:$0xff]  ;;  %v570_v62 = vld [vmem:[%s1284_s4 + $0x10] sm:$0xff] }
  0x14   :  { %754 = vmatprep.subr.bf16.mxu0 %v854_v17  ;;  %808 = vmatprep.mubr.msk.f32.mxu1 %vm928_vm0, %v927_v48  ;;  %v569_v63 = vld [vmem:[%s1284_s4 + $0x8] sm:$0xff]  ;;  %v568_v0 = vld [vmem:[%s1284_s4] sm:$0xff] }
  0x16   :  { %302 = vadd.xlane.f32.xlu1 %v276_v21  ;;  %304 = vadd.xlane.f32.xlu0 %v277_v24 }
  0x17   :  { %755 = vmatpush3.bf16.msra.mxu0 %v854_v17 }
  0x18   :  { %756 = vmatprep.subr.bf16.mxu0 %v855_v23 }
  0x1a   :  { %298 = vadd.xlane.f32.xlu1 %v274_v27  ;;  %300 = vadd.xlane.f32.xlu0 %v275_v30 }
  0x1b   :  { %757 = vmatpush3.bf16.msra.mxu0 %v855_v23 }
  0x1c   :  { %758 = vmatprep.subr.bf16.mxu0 %v856_v29 }
  0x1e   :  { %294 = vadd.xlane.f32.xlu1 %v272_v34  ;;  %296 = vadd.xlane.f32.xlu0 %v273_v36 }
  0x1f   :  { %759 = vmatpush3.bf16.msra.mxu0 %v856_v29 }
  0x20   :  { %811 = vmatprep.subr.mxu0 %v927_v48 }
  0x22   :  { %761 = vmatmul.mubr.bf16.vlgmr.msra.gmra.mxu0 %v27_v33  ;;  %290 = vadd.xlane.f32.xlu1 %v270_v38 }
  0x23   :  { %764 = vmatprep.mubr.bf16.mxu0 %v29_v32  ;;  %292 = vadd.xlane.f32.xlu0 %v271_v40 }
  0x24   :  { %812 = vmatpush3.msra.mxu0 %v583_v49 }
  0x25   :  { %813 = vmatprep.subr.mxu0 %v927_v48 }
  0x26   :  { %286 = vadd.xlane.f32.xlu1 %v268_v42  ;;  %814 = vmatpush3.msra.mxu0 %v582_v50 }
  0x27   :  { %288 = vadd.xlane.f32.xlu0 %v269_v44  ;;  %815 = vmatprep.subr.mxu0 %v927_v48 }
  0x28   :  { %816 = vmatpush3.msra.mxu0 %v581_v51 }
  0x29   :  { %817 = vmatprep.subr.mxu0 %v927_v48 }
  0x2a   :  { %765 = vmatmul.mubr.bf16.gmra.mxu0 %v31_v26  ;;  %282 = vadd.xlane.f32.xlu1 %v266_v46 }
  0x2b   :  { %768 = vmatprep.mubr.bf16.mxu0 %v33_v20  ;;  %284 = vadd.xlane.f32.xlu0 %v267_v47  ;;  %v1106_v20 = vld [vmem:[%s1282_s2] ss:$0 sm:$0xff] }
  0x2c   :  { %818 = vmatpush3.msra.mxu0 %v580_v52 }
  0x2d   :  { %819 = vmatprep.subr.mxu0 %v927_v48 }
  0x2e   :  { %820 = vmatpush3.msra.mxu0 %v579_v53 }
  0x2f   :  { %821 = vmatprep.subr.mxu0 %v927_v48 }
  0x30   :  { %822 = vmatpush3.msra.mxu0 %v578_v54 }
  0x31   :  { %823 = vmatprep.subr.mxu0 %v927_v48 }
  0x32   :  { %769 = vmatmul.mubr.bf16.gmra.mxu0 %v35_v14 }
  0x33   :  { %772 = vmatprep.mubr.bf16.mxu0 %v985_v5  ;;  %824 = vmatpush3.msra.mxu0 %v577_v55 }
  0x34   :  { %825 = vmatprep.subr.mxu0 %v927_v48 }
  0x35   :  { %826 = vmatpush3.msra.mxu0 %v576_v56 }
  0x36   :  { %827 = vmatprep.subr.mxu0 %v927_v48 }
  0x37   :  { %828 = vmatpush3.msra.mxu0 %v575_v57 }
  0x38   :  { %829 = vmatprep.subr.mxu0 %v927_v48 }
  0x39   :  { %830 = vmatpush3.msra.mxu0 %v574_v58 }
  0x3a   :  { %773 = vmatmul.mubr.bf16.gmra.mxu0 %v990_v6  ;;  %831 = vmatprep.subr.mxu0 %v927_v48 }
  0x3b   :  { %843 = vmatprep.mubr.msk.f32.mxu0 %vm928_vm0, %v927_v48  ;;  %832 = vmatpush3.msra.mxu0 %v573_v59 }
  0x3c   :  { %833 = vmatprep.subr.mxu0 %v927_v48 }
  0x3d   :  { %834 = vmatpush3.msra.mxu0 %v572_v60 }
  0x3e   :  { %835 = vmatprep.subr.mxu0 %v927_v48 }
  0x3f   :  { %836 = vmatpush3.msra.mxu0 %v571_v61 }
  0x40   :  { %837 = vmatprep.subr.mxu0 %v927_v48 }
  0x41   :  { %838 = vmatpush3.msra.mxu0 %v570_v62 }
  0x42   :  { %839 = vmatprep.subr.mxu0 %v927_v48 }
  0x43   :  { %840 = vmatpush3.msra.mxu0 %v569_v63 }
  0x44   :  { %841 = vmatprep.subr.mxu0 %v927_v48 }
  0x45   :  { %842 = vmatpush3.msra.mxu0 %v568_v0 }
  0x97   :  { %v309_v1 = vpop.xlane.xlu1 %308  ;;  %v313_v2 = vpop.xlane.xlu0 %312 }
  0x98   :  { %v334_v35 = vadd.f32 %v1106_v20, %v309_v1  ;;  %v336_v36 = vadd.f32 %v1106_v20, %v313_v2 }
  0x9b   :  { %v307_v5 = vpop.xlane.xlu1 %306  ;;  %v311_v7 = vpop.xlane.xlu0 %310 }
  0x9c   :  { %v335_v23 = vadd.f32 %v1106_v20, %v311_v7  ;;  %v333_v28 = vadd.f32 %v1106_v20, %v307_v5 }
  0x9f   :  { %v303_v10 = vpop.xlane.xlu1 %302  ;;  %v305_v12 = vpop.xlane.xlu0 %304 }
  0xa0   :  { %v332_v25 = vadd.f32 %v1106_v20, %v305_v12  ;;  %v331_v30 = vadd.f32 %v1106_v20, %v303_v10 }
  0xa3   :  { %v299_v15 = vpop.xlane.xlu1 %298  ;;  %v301_v17 = vpop.xlane.xlu0 %300 }
  0xa4   :  { %v330_v37 = vadd.f32 %v1106_v20, %v301_v17  ;;  %v329_v46 = vadd.f32 %v1106_v20, %v299_v15 }
  0xa7   :  { %v295_v21 = vpop.xlane.xlu1 %294  ;;  %v297_v24 = vpop.xlane.xlu0 %296 }
  0xa8   :  { %v328_v54 = vadd.f32 %v1106_v20, %v297_v24  ;;  %v327_v60 = vadd.f32 %v1106_v20, %v295_v21 }
  0xab   :  { %v291_v38 = vpop.xlane.xlu1 %290 }
  0xac   :  { %v293_v41 = vpop.xlane.xlu0 %292  ;;  %v325_v5 = vadd.f32 %v1106_v20, %v291_v38 }
  0xad   :  { %v326_v7 = vadd.f32 %v1106_v20, %v293_v41 }
  0xaf   :  { %v287_v61 = vpop.xlane.xlu1 %286 }
  0xb0   :  { %v289_v63 = vpop.xlane.xlu0 %288  ;;  %v323_v15 = vadd.f32 %v1106_v20, %v287_v61 }
  0xe2   :  { %v1095_v3 = vpop.f32.mrf.mxu0 }
  0xe4   :  { %v1097_v4 = vpop.f32.mrf.mxu0 }
  0xe6   :  { %v1099_v6 = vpop.f32.mrf.mxu0 }
  0xe7   :  { %v340_v21 = vmul.f32 2.0, %v1099_v6  ;;  %v337_v6 = vmul.f32 2.0, %v1097_v4 }
  0xe8   :  { %v1101_v8 = vpop.f32.mrf.mxu0 }
  0xea   :  { %v766_v9 = vpop.f32.mrf.mxu0 }
  0xeb   :  { %v343_v62 = vmul.f32 2.0, %v766_v9 }
  0xec   :  { %v203_v11 = vpop.f32.mrf.mxu0 }
  0xed   :  { %v341_v10 = vmul.f32 2.0, %v203_v11  ;;  %v283_v11 = vpop.xlane.xlu1 %282 }
  0xee   :  { %v767_v13 = vpop.f32.mrf.mxu0 }
  0xef   :  { %v344_v56 = vmul.f32 2.0, %v767_v13 }
  0xf0   :  { %v206_v14 = vpop.f32.mrf.mxu0 }
  0xf1   :  { %v360_v12 = vsub.f32 %v328_v54, %v344_v56  ;;  %v342_v13 = vmul.f32 2.0, %v206_v14  ;;  %v285_v14 = vpop.xlane.xlu0 %284 }
  0xf2   :  { %v770_v16 = vpop.f32.mrf.mxu0 }
  0xf3   :  { %v347_v31 = vmul.f32 2.0, %v770_v16  ;;  %v359_v16 = vsub.f32 %v327_v60, %v343_v62  ;;  %v358_v24 = vsub.f32 %v326_v7, %v342_v13 }
  0xf4   :  { %v219_v18 = vpop.f32.mrf.mxu0 }
  0xf5   :  { %v363_v47 = vsub.f32 %v331_v30, %v347_v31  ;;  %v345_v49 = vmul.f32 2.0, %v219_v18  ;;  %v339_v18 = vmul.f32 2.0, %v1095_v3  ;;  %v338_v31 = vmul.f32 2.0, %v1101_v8 }
  0xf6   :  { %v771_v19 = vpop.f32.mrf.mxu0 }
  0xf7   :  { %v348_v26 = vmul.f32 2.0, %v771_v19  ;;  %v1128_v0 = vmax.f32 %v363_v47, 0.0  ;;  %v361_v1 = vsub.f32 %v329_v46, %v345_v49  ;;  %v324_v19 = vadd.f32 %v1106_v20, %v289_v63 }
  0xf8   :  { %v222_v22 = vpop.f32.mrf.mxu0  ;;  %v355_v3 = vsub.f32 %v323_v15, %v339_v18 }
  0xf9   :  { %v364_v39 = vsub.f32 %v332_v25, %v348_v26  ;;  %v346_v42 = vmul.f32 2.0, %v222_v22  ;;  %v1141_v17 = vmax.f32 %v361_v1, 0.0  ;;  %v357_v22 = vsub.f32 %v325_v5, %v341_v10 }
  0xfa   :  { %v774_v27 = vpop.f32.mrf.mxu0  ;;  %v321_v25 = vadd.f32 %v1106_v20, %v283_v11  ;;  %v1150_v26 = vmax.f32 %v359_v16, 0.0  ;;  %vm457_vm10 = vcmp.eq.f32.partialorder %v1128_v0, inf  ;;  %v460_v15 = vand.u32 2147483648, %v1128_v0 }
  0xfb   :  { %v351_v29 = vmul.f32 2.0, %v774_v27  ;;  %v1122_v55 = vmax.f32 %v364_v39, 0.0  ;;  %v362_v57 = vsub.f32 %v330_v37, %v346_v42  ;;  %v1154_v30 = vmax.f32 %v357_v22, 0.0 }
  0xfc   :  { %v235_v32 = vpop.f32.mrf.mxu0  ;;  %v353_v4 = vsub.f32 %v321_v25, %v337_v6  ;;  %vm459_vm13 = vcmp.eq.f32.partialorder %v1128_v0, 0.0  ;;  %vm443_vm14 = vcmp.eq.f32.partialorder %v1141_v17, inf }
  0xfd   :  { %v367_v33 = vsub.f32 %v335_v23, %v351_v29  ;;  %v349_v34 = vmul.f32 2.0, %v235_v32  ;;  %v1136_v9 = vmax.f32 %v362_v57, 0.0  ;;  %v1146_v23 = vmax.f32 %v360_v12, 0.0 }
  0xfe   :  { %v775_v40 = vpop.f32.mrf.mxu0  ;;  %v322_v29 = vadd.f32 %v1106_v20, %v285_v14  ;;  %v1159_v32 = vmax.f32 %v358_v24, 0.0  ;;  %vm464_vm8 = vcmp.eq.f32.partialorder %v1122_v55, inf  ;;  %v467_v7 = vand.u32 2147483648, %v1122_v55 }
  0xff   :  { %v1115_v43 = vmax.f32 %v367_v33, 0.0  ;;  %v365_v44 = vsub.f32 %v333_v28, %v349_v34  ;;  %v352_v45 = vmul.f32 2.0, %v775_v40  ;;  %v356_v28 = vsub.f32 %v324_v19, %v340_v21 }
 0x100   :  { %v238_v50 = vpop.f32.mrf.mxu0  ;;  %v354_v38 = vsub.f32 %v322_v29, %v338_v31  ;;  %vm466_vm11 = vcmp.eq.f32.partialorder %v1122_v55, 0.0  ;;  %vm450_vm12 = vcmp.eq.f32.partialorder %v1136_v9, inf  ;;  %v453_v21 = vand.u32 2147483648, %v1136_v9 }
 0x101   :  { %873 = vrsqrt.f32 %v1115_v43  ;;  %v1119_v51 = vmax.f32 %v365_v44, 0.0  ;;  %v368_v52 = vsub.f32 %v336_v36, %v352_v45  ;;  %v350_v53 = vmul.f32 2.0, %v238_v50 }
 0x102   :  { %v1163_v36 = vmax.f32 %v355_v3, 0.0  ;;  %v1165_v37 = vmax.f32 %v356_v28, 0.0  ;;  %vm485_vm3 = vcmp.eq.f32.partialorder %v1115_v43, inf  ;;  %v488_v49 = vand.u32 2147483648, %v1115_v43 }
 0x103   :  { %v1124_v58 = vmax.f32 %v368_v52, 0.0  ;;  %v366_v59 = vsub.f32 %v334_v35, %v350_v53  ;;  %875 = vrsqrt.f32 %v1119_v51  ;;  %v1181_v50 = vmax.f32 %v354_v38, 0.0 }
 0x104   :  { %vm487_vm5 = vcmp.eq.f32.partialorder %v1115_v43, 0.0  ;;  %vm471_vm6 = vcmp.eq.f32.partialorder %v1119_v51, inf  ;;  %v474_v62 = vand.u32 2147483648, %v1119_v51  ;;  %vm473_vm9 = vcmp.eq.f32.partialorder %v1119_v51, 0.0 }
 0x105   :  { %877 = vrsqrt.f32 %v1124_v58  ;;  %v1131_v2 = vmax.f32 %v366_v59, 0.0  ;;  %vm492_vm1 = vcmp.eq.f32.partialorder %v1124_v58, inf  ;;  %vm494_vm2 = vcmp.eq.f32.partialorder %v1124_v58, 0.0 }
 0x106   :  { %879 = vrsqrt.f32 %v1122_v55  ;;  %v495_v40 = vand.u32 2147483648, %v1124_v58  ;;  %vm452_vm15 = vcmp.eq.f32.partialorder %v1136_v9, 0.0  ;;  %v446_v24 = vand.u32 2147483648, %v1141_v17 }
 0x107   :  { %881 = vrsqrt.f32 %v1131_v2  ;;  %vm478_vm4 = vcmp.eq.f32.partialorder %v1131_v2, inf  ;;  %v481_v57 = vand.u32 2147483648, %v1131_v2  ;;  %vm480_vm7 = vcmp.eq.f32.partialorder %v1131_v2, 0.0 }
 0x108   :  { %883 = vrsqrt.f32 %v1128_v0  ;;  %vm436_vm0 = vcmp.eq.f32.partialorder %v1146_v23, inf  ;;  %v439_v28 = vand.u32 2147483648, %v1146_v23 }
 0x109   :  { %885 = vrsqrt.f32 %v1136_v9 }
 0x10a   :  { %887 = vrsqrt.f32 %v1141_v17 }
 0x10b   :  { %889 = vrsqrt.f32 %v1146_v23 }
 0x10c   :  { %891 = vrsqrt.f32 %v1150_v26 }
 0x10d   :  { %893 = vrsqrt.f32 %v1154_v30 }
 0x10e   :  { %v874_v27 = vpop.eup %873  ;;  %895 = vrsqrt.f32 %v1159_v32 }
 0x10f   :  { %v484_v34 = vmul.f32 %v874_v27, %v1115_v43  ;;  %897 = vrsqrt.f32 %v1165_v37 }
 0x110   :  { %v876_v33 = vpop.eup %875  ;;  %899 = vrsqrt.f32 %v1163_v36 }
 0x111   :  { %v486_v42 = vsel %vm485_vm3, %v1115_v43, %v484_v34  ;;  %v470_v45 = vmul.f32 %v876_v33, %v1119_v51  ;;  %901 = vrsqrt.f32 %v1181_v50  ;;  %vm438_vm3 = vcmp.eq.f32.partialorder %v1146_v23, 0.0 }
 0x112   :  { %v878_v35 = vpop.eup %877  ;;  %v489_v56 = vsel %vm487_vm5, %v488_v49, %v486_v42  ;;  %v432_v33 = vand.u32 2147483648, %v1150_v26  ;;  %vm431_vm5 = vcmp.eq.f32.partialorder %v1150_v26, 0.0 }
 0x113   :  { %v880_v20 = vpop.eup %879  ;;  %v491_v8 = vmul.f32 %v878_v35, %v1124_v58  ;;  %v472_v43 = vsel %vm471_vm6, %v1119_v51, %v470_v45  ;;  %vm415_vm6 = vcmp.eq.f32.partialorder %v1154_v30, inf }
 0x114   :  { %v882_v39 = vpop.eup %881  ;;  %v463_v53 = vmul.f32 %v880_v20, %v1122_v55  ;;  %v475_v5 = vsel %vm473_vm9, %v474_v62, %v472_v43  ;;  %vm417_vm9 = vcmp.eq.f32.partialorder %v1154_v30, 0.0 }
 0x115   :  { %v493_v41 = vsel %vm492_vm1, %v1124_v58, %v491_v8  ;;  %v477_v44 = vmul.f32 %v882_v39, %v1131_v2  ;;  %v884_v46 = vpop.eup %883  ;;  %v1190_v58 = vmax.f32 %v353_v4, 0.0  ;;  %vm445_vm1 = vcmp.eq.f32.partialorder %v1141_v17, 0.0 }
 0x116   :  { %v496_v47 = vsel %vm494_vm2, %v495_v40, %v493_v41  ;;  %v886_v54 = vpop.eup %885  ;;  %v456_v59 = vmul.f32 %v884_v46, %v1128_v0  ;;  %v465_v63 = vsel %vm464_vm8, %v1122_v55, %v463_v53  ;;  %vm429_vm2 = vcmp.eq.f32.partialorder %v1150_v26, inf }
 0x117   :  { %777 = vmatpush3.msra.mxu1 %v496_v47  ;;  %v479_v52 = vsel %vm478_vm4, %v1131_v2, %v477_v44  ;;  %v888_v60 = vpop.eup %887  ;;  %v449_v1 = vmul.f32 %v886_v54, %v1136_v9  ;;  %903 = vrsqrt.f32 %v1190_v58  ;;  %v468_v13 = vsel %vm466_vm11, %v467_v7, %v465_v63 }
 0x118   :  { %778 = vmatprep.subr.mxu1 %v927_v48  ;;  %v482_v61 = vsel %vm480_vm7, %v481_v57, %v479_v52  ;;  %v890_v2 = vpop.eup %889  ;;  %v458_v10 = vsel %vm457_vm10, %v1128_v0, %v456_v59  ;;  %v442_v51 = vmul.f32 %v888_v60, %v1141_v17  ;;  %vm422_vm4 = vcmp.eq.f32.partialorder %v1159_v32, inf  ;;  %v693_v59 = vld [vmem:[%s1285_s5] ss:$0 sm:$0xff] }
 0x119   :  { %779 = vmatpush3.msra.mxu1 %v489_v56  ;;  %v892_v12 = vpop.eup %891  ;;  %v451_v18 = vsel %vm450_vm12, %v1136_v9, %v449_v1  ;;  %v435_v55 = vmul.f32 %v890_v2, %v1146_v23  ;;  %v461_v11 = vsel %vm459_vm13, %v460_v15, %v458_v10  ;;  %v425_v4 = vand.u32 2147483648, %v1159_v32 }
 0x11a   :  { %780 = vmatprep.subr.mxu1 %v927_v48  ;;  %v894_v16 = vpop.eup %893  ;;  %v444_v22 = vsel %vm443_vm14, %v1141_v17, %v442_v51  ;;  %v428_v14 = vmul.f32 %v892_v12, %v1150_v26  ;;  %v454_v0 = vsel %vm452_vm15, %v453_v21, %v451_v18  ;;  %vm424_vm7 = vcmp.eq.f32.partialorder %v1159_v32, 0.0 }
 0x11b   :  { %781 = vmatpush3.msra.mxu1 %v482_v61  ;;  %v896_v19 = vpop.eup %895  ;;  %v437_v27 = vsel %vm436_vm0, %v1146_v23, %v435_v55  ;;  %v447_v9 = vsel %vm445_vm1, %v446_v24, %v444_v22  ;;  %v414_v31 = vmul.f32 %v894_v16, %v1154_v30  ;;  %v418_v40 = vand.u32 2147483648, %v1154_v30 }
 0x11c   :  { %782 = vmatprep.subr.mxu1 %v927_v48  ;;  %v898_v25 = vpop.eup %897  ;;  %v421_v3 = vmul.f32 %v896_v19, %v1159_v32  ;;  %v430_v6 = vsel %vm429_vm2, %v1150_v26, %v428_v14  ;;  %v440_v17 = vsel %vm438_vm3, %v439_v28, %v437_v27  ;;  %vm408_vm8 = vcmp.eq.f32.partialorder %v1165_v37, inf }
 0x11d   :  { %783 = vmatpush3.msra.mxu1 %v475_v5  ;;  %v900_v29 = vpop.eup %899  ;;  %v407_v35 = vmul.f32 %v898_v25, %v1165_v37  ;;  %v433_v23 = vsel %vm431_vm5, %v432_v33, %v430_v6  ;;  %v416_v38 = vsel %vm415_vm6, %v1154_v30, %v414_v31  ;;  %v411_v44 = vand.u32 2147483648, %v1165_v37 }
 0x11e   :  { %784 = vmatprep.subr.mxu1 %v927_v48  ;;  %v423_v34 = vsel %vm422_vm4, %v1159_v32, %v421_v3  ;;  %v902_v20 = vpop.eup %901  ;;  %v400_v8 = vmul.f32 %v900_v29, %v1163_v36  ;;  %v419_v32 = vsel %vm417_vm9, %v418_v40, %v416_v38  ;;  %vm401_vm10 = vcmp.eq.f32.partialorder %v1163_v36, inf }
 0x11f   :  { %785 = vmatpush3.msra.mxu1 %v468_v13  ;;  %v426_v39 = vsel %vm424_vm7, %v425_v4, %v423_v34  ;;  %v409_v41 = vsel %vm408_vm8, %v1165_v37, %v407_v35  ;;  %v393_v42 = vmul.f32 %v902_v20, %v1181_v50  ;;  %vm410_vm11 = vcmp.eq.f32.partialorder %v1165_v37, 0.0 }
 0x120   :  { %786 = vmatprep.subr.mxu1 %v927_v48  ;;  %v402_v45 = vsel %vm401_vm10, %v1163_v36, %v400_v8  ;;  %v412_v30 = vsel %vm410_vm11, %v411_v44, %v409_v41  ;;  %v404_v47 = vand.u32 2147483648, %v1163_v36  ;;  %vm394_vm12 = vcmp.eq.f32.partialorder %v1181_v50, inf }
 0x121   :  { %787 = vmatpush3.msra.mxu1 %v461_v11  ;;  %vm403_vm13 = vcmp.eq.f32.partialorder %v1163_v36, 0.0  ;;  %v395_v49 = vsel %vm394_vm12, %v1181_v50, %v393_v42  ;;  %v397_v37 = vand.u32 2147483648, %v1181_v50  ;;  %vm387_vm14 = vcmp.eq.f32.partialorder %v1190_v58, inf  ;;  %v497_v36 = vld [vmem:[%s1283_s3] sm:$0x3]  ;;  %s905_s3 = scalar_lea.vmem %s669_s14, 32 }
 0x122   :  { %788 = vmatprep.subr.mxu1 %v927_v48  ;;  %v405_v52 = vsel %vm403_vm13, %v404_v47, %v402_v45  ;;  %vm396_vm15 = vcmp.eq.f32.partialorder %v1181_v50, 0.0  ;;  %v390_v56 = vand.u32 2147483648, %v1190_v58  ;;  %vm389_vm0 = vcmp.eq.f32.partialorder %v1190_v58, 0.0  ;;  %p906_p0 = scmp.ne.s32.totalorder %s669_s14, %s905_s3  ;;  %p911_p2 = scmp.lt.s32.totalorder %s905_s3, %s905_s3 }
 0x123   :  { %789 = vmatpush3.msra.mxu1 %v454_v0  ;;  %v398_v54 = vsel %vm396_vm15, %v397_v37, %v395_v49 }
 0x124   :  { %790 = vmatprep.subr.mxu1 %v927_v48  ;;  %v904_v26 = vpop.eup %903  ;;  %p912_p3 = por %p911_p2, %p910_p1 }
 0x125   :  { %791 = vmatpush3.msra.mxu1 %v447_v9  ;;  %v386_v46 = vmul.f32 %v904_v26, %v1190_v58 }
 0x126   :  { %792 = vmatprep.subr.mxu1 %v927_v48  ;;  %p913_p4 = pnand %p912_p3, %p906_p0 }
 0x127   :  { %793 = vmatpush3.msra.mxu1 %v440_v17  ;;  %v388_v53 = vsel %vm387_vm14, %v1190_v58, %v386_v46 }
 0x128   :  { %794 = vmatprep.subr.mxu1 %v927_v48  ;;  %v391_v57 = vsel %vm389_vm0, %v390_v56, %v388_v53 }
 0x129   :  { %795 = vmatpush3.msra.mxu1 %v433_v23 }
 0x12a   :  { %796 = vmatprep.subr.mxu1 %v927_v48 }
 0x12b   :  { %797 = vmatpush3.msra.mxu1 %v426_v39 }
 0x12c   :  { %798 = vmatprep.subr.mxu1 %v927_v48 }
 0x12d   :  { %799 = vmatpush3.msra.mxu1 %v419_v32 }
 0x12e   :  { %800 = vmatprep.subr.mxu1 %v927_v48 }
 0x12f   :  { %801 = vmatpush3.msra.mxu1 %v412_v30 }
 0x130   :  { %802 = vmatprep.subr.mxu1 %v927_v48 }
 0x131   :  { %803 = vmatpush3.msra.mxu1 %v405_v52 }
 0x132   :  { %804 = vmatprep.subr.mxu1 %v927_v48 }
 0x133   :  { %805 = vmatpush3.msra.mxu1 %v398_v54 }
 0x134   :  { %806 = vmatprep.subr.mxu1 %v927_v48 }
 0x135   :  { %807 = vmatpush3.msra.mxu1 %v391_v57 }
 0x136   :  { %809 = vmatmul.mubr.f32.vlgmr.msra.gmra.mxu1 %v497_v36 }
 0x1f6   :  { %v564_v50 = vpop.f32.mrf.mxu1 }
 0x1f7   :  { %844 = vmatmul.mubr.f32.vlgmr.msra.gmra.mxu0 %v564_v50 }
 0x1f8   :  { %v810_v43 = vpop.f32.mrf.mxu1 }
 0x2b7   :  { %v657_v60 = vpop.f32.mrf.mxu0 }
 0x2b8   :  { %v658_v58 = vadd.f32 %v693_v59, %v657_v60 }
 0x2b9   :  { %v845_v61 = vpop.f32.mrf.mxu0 }
 0x2ba   :  { %661 = vst [vmem:[#allocation2] sm:$0x3] %v658_v58 }
 0x2bb   :  { %916 = shalt.err (!%p913_p4)
}
 0x2bc   :  { %671 = dma.vmem_to_hbm [thread:$0]  %s669_s14, 32, %s1286_s6, [#allocation3]  }
 0x2bd   :  { %925 = dma.done.wait [#allocation3], 32  }
 0x2be   :  { %926 = vsyncadd [#allocation3], 4294967264 }
 0x2bf   :  { %675 = vsyncpa [#allocation3], 1 }

</bundles_post_ra>
